<compile_context>
chip_gen: v5e
topology: v5e:2x2
jax: 0.10.0
libtpu: 0.0.40
codegen_flags: <defaults>
</compile_context>

<pallas_src>
import jax
import jax.numpy as jnp
from jax import lax
from jax.experimental import pallas as pl
from jax.experimental.pallas import tpu as pltpu

_VMEM_LIMIT_BYTES = 48 * 1024 * 1024  # raise scoped VMEM (v5e default is 16 MiB)


# ---------------------------------------------------------------------------
# default pooling kernel: tanh(x0 @ W.T + b) on one (tm, tn) output tile
# ---------------------------------------------------------------------------
def _make_default_kernel(tn):
    def kernel(x_ref, w_ref, b_ref, o_ref):
        # x_ref: (tm, H)  first-token activations
        # w_ref: (tn, H)  torch-layout weight tile (H_out tile, H_in)
        # b_ref: (1, H)   full-width bias, pinned to block (0, 0)
        # o_ref: (tm, tn)
        j = pl.program_id(0)  # H_out tile index (outer grid axis)
        y = lax.dot_general(
            x_ref[...],
            w_ref[...],
            dimension_numbers=(((1,), (1,)), ((), ())),  # contract H_in of both
            preferred_element_type=jnp.float32,
        )
        start = j * tn
        if tn % 128 == 0:
            start = pl.multiple_of(start, 128)
        b = b_ref[:, pl.ds(start, tn)].astype(jnp.float32)
        o_ref[...] = jnp.tanh(y + b).astype(o_ref.dtype)

    return kernel


# ---------------------------------------------------------------------------
# mean pooling kernel: streaming sum over seq tiles, scale at the end
# ---------------------------------------------------------------------------
def _make_mean_kernel(inv_s, ts, seq_len, mask_tail, use_scratch):
    # inv_s / ts / seq_len / flags are Python scalars → inlined literals
    # (no captured-array constants).
    def kernel(x_ref, o_ref, *scratch):
        acc = scratch[0] if use_scratch else o_ref  # f32 accumulator
        k = pl.program_id(1)

        @pl.when(k == 0)
        def _():
            acc[...] = jnp.zeros_like(acc)

        x = x_ref[...].astype(jnp.float32)
        if mask_tail:
            # zero out the padded rows of the last (partial) seq tile
            idx = lax.broadcasted_iota(jnp.int32, (1, ts, 1), 1)
            x = jnp.where(idx < (seq_len - k * ts), x, 0.0)
        acc[...] += jnp.sum(x, axis=1)

        @pl.when(k == pl.num_programs(1) - 1)
        def _():
            o_ref[...] = (acc[...] * inv_s).astype(o_ref.dtype)

    return kernel


# ---------------------------------------------------------------------------
# tile helpers
# ---------------------------------------------------------------------------
def _largest_divisor_tile(dim, gran, max_tile):
    """Largest multiple of `gran` that divides `dim` and is <= max_tile, else None."""
    best = None
    t = gran
    upper = min(dim, max_tile)
    while t <= upper:
        if dim % t == 0:
            best = t
        t += gran
    return best


def protein_bert_pooler(hidden_states, weight, bias, pooling_method="default"):
    """hidden_states: (B, S, H); weight: (H_out, H_in) torch layout; bias: (H,)."""
    B, S, H = hidden_states.shape

    if pooling_method == "default":
        w_bytes = weight.dtype.itemsize

        # batch tile: up to 256 rows, multiple of 8 (partial last block is fine,
        # padded output rows are discarded on writeback)
        tm = B if B < 8 else min(256, (B // 8) * 8)

        # H_out tile: largest 128-multiple divisor of H within a ~8 MiB/buffer
        # W budget (double-buffered → <= 16 MiB), capped at 1024.
        if H % 128 == 0:
            max_tn_budget = (8 * 1024 * 1024) // max(1, H * w_bytes)
            max_tn = min(1024, max(128, (max_tn_budget // 128) * 128))
            tn = _largest_divisor_tile(H, 128, max_tn) or 128
        else:
            tn = H  # tiny / odd hidden size: one full-width tile

        n_j = pl.cdiv(H, tn)
        n_i = pl.cdiv(B, tm)
        # keep >= 2 blocks along a parallel axis so both v7x TCs get work
        if n_j == 1 and n_i == 1:
            if tn % 256 == 0:
                tn //= 2
            elif B >= 16:
                tm = max(8, ((tm // 2) // 8) * 8)
            n_j = pl.cdiv(H, tn)
            n_i = pl.cdiv(B, tm)

        if H % 128 == 0:
            # Strided DMA of token 0 straight out of (B, S, H): view as
            # (B, S*H) (metadata-only reshape), pin the column block to [0, H).
            x = hidden_states.reshape(B, S * H)
        else:
            x = hidden_states[:, 0]

        b2 = bias.reshape(1, H)

        # H_out tiles outer, batch tiles inner → the W block index is constant
        # across the inner loop, so W is fetched from HBM exactly n_j times.
        grid = (n_j, n_i)
        return pl.pallas_call(
            _make_default_kernel(tn),
            out_shape=jax.ShapeDtypeStruct((B, H), hidden_states.dtype),
            grid_spec=pltpu.PrefetchScalarGridSpec(
                num_scalar_prefetch=0,
                grid=grid,
                in_specs=[
                    pl.BlockSpec((tm, H), lambda j, i: (i, 0)),   # token-0 acts
                    pl.BlockSpec((tn, H), lambda j, i: (j, 0)),   # W, torch layout
                    pl.BlockSpec((1, H), lambda j, i: (0, 0)),    # full-width bias
                ],
                out_specs=pl.BlockSpec((tm, tn), lambda j, i: (i, j)),
            ),
            compiler_params=pltpu.CompilerParams(
                dimension_semantics=("parallel", "parallel"),
                vmem_limit_bytes=_VMEM_LIMIT_BYTES,
            ),
        )(x, weight, b2)

    elif pooling_method == "bos":
        return hidden_states[:, 0]

    elif pooling_method == "mean":
        x_bytes = hidden_states.dtype.itemsize
        bm = B if B < 8 else min(64, (B // 8) * 8)

        # seq tile from a byte budget (~6 MiB per input buffer, v7x-safe even
        # double-buffered); prefer an exact divisor of S, otherwise mask the tail.
        budget = 6 * 1024 * 1024
        ts_cap = max(8, budget // max(1, bm * H * x_bytes))
        if S < 8:
            ts, mask_tail = S, False
        else:
            ts = _largest_divisor_tile(S, 8, min(S, ts_cap))
            if ts is None:
                ts = max(8, (min(S, ts_cap) // 8) * 8)
                mask_tail = (S % ts) != 0
            else:
                mask_tail = False

        use_scratch = hidden_states.dtype != jnp.float32
        scratch = [pltpu.VMEM((bm, H), jnp.float32)] if use_scratch else []

        grid = (pl.cdiv(B, bm), pl.cdiv(S, ts))
        kernel = _make_mean_kernel(1.0 / S, ts, S, mask_tail, use_scratch)
        return pl.pallas_call(
            kernel,
            out_shape=jax.ShapeDtypeStruct((B, H), hidden_states.dtype),
            grid_spec=pltpu.PrefetchScalarGridSpec(
                num_scalar_prefetch=0,
                grid=grid,
                in_specs=[pl.BlockSpec((bm, ts, H), lambda i, k: (i, k, 0))],
                out_specs=pl.BlockSpec((bm, H), lambda i, k: (i, 0)),
                scratch_shapes=scratch,
            ),
            compiler_params=pltpu.CompilerParams(
                dimension_semantics=("parallel", "arbitrary"),
                vmem_limit_bytes=_VMEM_LIMIT_BYTES,
            ),
        )(hidden_states)

    elif pooling_method == "none":
        return hidden_states

    else:
        raise ValueError(f"unknown pooling_method {pooling_method}")


if __name__ == "__main__":
    # Small but tile-exercising config: batch=8, seq=250 (not a multiple of 8 →
    # exercises the masked seq-remainder path), hidden=512 (default path grid
    # splits H_out into 2 tiles for the megacore rule).
    B, S, H = 8, 250, 512
    key = jax.random.PRNGKey(0)
    k_x, k_w, k_b = jax.random.split(key, 3)

    hidden_states = jax.random.normal(k_x, (B, S, H), dtype=jnp.float32)
    # nn.Linear(H, H): weight (H_out, H_in), bias (H,) — torch layout, untouched.
    weight = jax.random.normal(k_w, (H, H), dtype=jnp.float32) * 0.02
    bias = jax.random.normal(k_b, (H,), dtype=jnp.float32) * 0.02

    # Hot path: default pooling (strided token-0 fetch + MXU matmul + tanh).
    out = jax.block_until_ready(
        protein_bert_pooler(hidden_states, weight, bias, pooling_method="default")
    )
    ref = jnp.tanh(hidden_states[:, 0] @ weight.T + bias)
    assert out.shape == (B, H)
    assert jnp.allclose(out, ref, atol=2e-2, rtol=2e-2), float(
        jnp.max(jnp.abs(out - ref))
    )

    # Mean pooling (seq-tiled streaming reduction with masked remainder).
    out_mean = jax.block_until_ready(
        protein_bert_pooler(hidden_states, weight, bias, pooling_method="mean")
    )
    ref_mean = jnp.mean(hidden_states, axis=1)
    assert jnp.allclose(out_mean, ref_mean, atol=1e-4, rtol=1e-4), float(
        jnp.max(jnp.abs(out_mean - ref_mean))
    )

    # Pure-glue branches.
    out_bos = protein_bert_pooler(hidden_states, weight, bias, pooling_method="bos")
    assert jnp.allclose(out_bos, hidden_states[:, 0])

    out_none = protein_bert_pooler(hidden_states, weight, bias, pooling_method="none")
    assert out_none.shape == (B, S, H)

    print("KERNEL_OK")
</pallas_src>

<mosaic_0001>
module attributes {stable_mosaic.version = 11 : i64} {
  func.func @kernel(%arg0: i32, %arg1: i32, %arg2: memref<8x512xf32, #tpu.memory_space<vmem>>, %arg3: memref<256x512xf32, #tpu.memory_space<vmem>>, %arg4: memref<1x512xf32, #tpu.memory_space<vmem>>, %arg5: memref<8x256xf32, #tpu.memory_space<vmem>>) attributes {dimension_semantics = [#tpu.dimension_semantics<parallel>, #tpu.dimension_semantics<parallel>], iteration_bounds = array<i64: 2, 1>, scalar_prefetch = 0 : i64, scratch_operands = 0 : i64, tpu.core_type = #tpu.core_type<tc>, window_params = [{transform_indices = @transform_0, window_bounds = array<i64: 8, 512>}, {transform_indices = @transform_1, window_bounds = array<i64: 256, 512>}, {pipeline_mode = #tpu.pipeline_mode<synchronous>, transform_indices = @transform_2, window_bounds = array<i64: 1, 512>}, {transform_indices = @transform_3, window_bounds = array<i64: 8, 256>}]} {
    %c0 = arith.constant 0 : index
    %c0_0 = arith.constant 0 : index
    %0 = vector.load %arg2[%c0, %c0_0] : memref<8x512xf32, #tpu.memory_space<vmem>>, vector<8x512xf32>
    %c0_1 = arith.constant 0 : index
    %c0_2 = arith.constant 0 : index
    %1 = vector.load %arg3[%c0_1, %c0_2] : memref<256x512xf32, #tpu.memory_space<vmem>>, vector<256x512xf32>
    %cst = arith.constant dense<0.000000e+00> : vector<8x256xf32>
    %2 = tpu.matmul %0, %1, %cst {dimension_numbers = #tpu.dot_dimension_numbers<[1], [1], [0], [0], [0, 0, 1, 0], [], []>} : vector<8x512xf32>, vector<256x512xf32>, vector<8x256xf32> -> vector<8x256xf32>
    %c256_i32 = arith.constant 256 : i32
    %3 = arith.muli %arg0, %c256_i32 : i32
    %4 = tpu.assume_multiple %3, 128 : i32
    %c0_3 = arith.constant 0 : index
    %5 = arith.index_cast %4 : i32 to index
    %6 = vector.load %arg4[%c0_3, %5] : memref<1x512xf32, #tpu.memory_space<vmem>>, vector<1x256xf32>
    %7 = vector.broadcast %6 : vector<1x256xf32> to vector<8x256xf32>
    %8 = arith.addf %2, %7 : vector<8x256xf32>
    %9 = math.tanh %8 : vector<8x256xf32>
    %c0_4 = arith.constant 0 : index
    %c0_5 = arith.constant 0 : index
    %10 = vector.load %arg5[%c0_4, %c0_5] : memref<8x256xf32, #tpu.memory_space<vmem>>, vector<8x256xf32>
    tpu.vector_store %arg5[%c0_4, %c0_5], %9 {strides = array<i32>} : memref<8x256xf32, #tpu.memory_space<vmem>>, vector<8x256xf32>,
    return
  }
  func.func @transform_0(%arg0: i32, %arg1: i32) -> (i32, i32) {
    %c0_i32 = arith.constant 0 : i32
    %c0_i32_0 = arith.constant 0 : i32
    return %arg1, %c0_i32 : i32, i32
  }
  func.func @transform_1(%arg0: i32, %arg1: i32) -> (i32, i32) {
    %c0_i32 = arith.constant 0 : i32
    %c0_i32_0 = arith.constant 0 : i32
    return %arg0, %c0_i32 : i32, i32
  }
  func.func @transform_2(%arg0: i32, %arg1: i32) -> (i32, i32) {
    %c0_i32 = arith.constant 0 : i32
    %c0_i32_0 = arith.constant 0 : i32
    %c0_i32_1 = arith.constant 0 : i32
    return %c0_i32, %c0_i32_0 : i32, i32
  }
  func.func @transform_3(%arg0: i32, %arg1: i32) -> (i32, i32) {
    %c0_i32 = arith.constant 0 : i32
    return %arg1, %arg0 : i32, i32
  }
}

</mosaic_0001>

<bundles_post_ra>
// kernel: tpu_custom_call.1
= control target key start
LH: loop header
LB: loop body
LE: loop exit
PB: predicated region body
PF: predicated region fallthrough
CT: control target
= control target key end

     0   :  { %s1301_s0 = inlined_call_operand.hbm [shape: f32[8,128000], index: 0, kind: input, shape index: {}]   ;;  %s1302_s1 = inlined_call_operand.hbm [shape: f32[512,512], index: 1, kind: input, shape index: {}]   ;;  %s1303_s2 = inlined_call_operand.hbm [shape: f32[1,512], index: 2, kind: input, shape index: {}]   ;;  %s1304_s3 = inlined_call_operand.hbm [shape: f32[8,512], index: 3, kind: output, shape index: {}]  }
   0x1   :  { %1305 = sst [smem:[#allocation13_spill]] %s1301_s0 }
   0x2   :  { %1306 = sst [smem:[#allocation14_spill]] %s1303_s2 }
   0x3   :  { %8 = vsyncpa [#allocation3], 0 }
   0x4   :  { %9 = vsyncpa [#allocation6], 0 }
   0x5   :  { %11 = vsyncpa [#allocation6 + $0x1], 0 }
   0x6   :  { %12 = vsyncpa [#allocation4], 0 }
   0x7   :  { %14 = vsyncpa [#allocation4 + $0x1], 0  ;;  %s994_s12 = smov 0   ;;  %s996_s13 = smov 0  }
   0x8   :  { %s998_s14 = smov 0   ;;  %s1000_s15 = smov 0  }
   0x9   :  { %s1002_s16 = smov 0   ;;  %s1004_s17 = smov 0  }
   0xa LB: > { %s1025_s18 = sadd.s32 4294967295, %s968_s17   ;;  %s676_s19 = sadd.s32 4294967294, %s968_s17   ;;  %s968_s17 = sphi %s1004_s17, %s20_s17   ;;  %s964_s16 = sphi %s1002_s16, %s1319_s16   ;;  %s960_s15 = sphi %s1000_s15, %s1318_s15   ;;  %s956_s14 = sphi %s998_s14, %s1317_s14   ;;  %s952_s13 = sphi %s996_s13, %s1316_s13   ;;  %s948_s12 = sphi %s994_s12, %s1315_s12  }
   0xb   : > { %s65_s20 = sadd.s32 1, %s956_s14  ;;  %p72_p0 = scmp.ne.s32.totalorder %s956_s14, %s952_s13 }
   0xc   : > { %p73_p1 = scmp.eq.s32.totalorder %s968_s17, 0  ;;  %p78_p2 = scmp.ne.s32.totalorder %s952_s13, %s948_s12 }
   0xd   : > { %p79_p3 = scmp.eq.s32.totalorder %s1025_s18, 0  ;;  %p125_p4 = scmp.eq.s32.totalorder %s1025_s18, 1 }
   0xe   : > { %p1036_p5 = por %p73_p1, %p72_p0  ;;  %p131_p6 = scmp.eq.s32.totalorder %s676_s19, 1 }
   0xf   : > { %p1042_p7 = por %p79_p3, %p78_p2  ;;  %p1046_p8 = por %p125_p4, %p72_p0 }
  0x10   : > { %p1050_p9 = por %p131_p6, %p78_p2  ;;  %p677_p10 = scmp.ge.s32.totalorder %s968_s17, 1 }
  0x11   : > { %p138_p11 = scmp.lt.s32.totalorder %s968_s17, 3  ;;  %s1311_s2 = sld [smem:[#allocation14_spill]] }
  0x12   : > { %s970_s29 = smov [#allocation7]   ;;  %p680_p13 = scmp.ge.s32.totalorder %s968_s17, 2 }
  0x13   : > { %p1059_p12 = pnand %p677_p10, %p138_p11  ;;  %s167_s30 = sshll.u32 %s970_s29, 4  ;;  %s168_s30 = int_to_ptr.vmem [resolvable:$true] %s167_s30 }
  0x14   : > { %p728_p1 = scmp.lt.s32.totalorder %s968_s17, 2  ;;  %s1314_s0 = sld [smem:[#allocation13_spill]] }
  0x15   : > { %p711_p0 = pneg %p1059_p12  ;;  %s971_s8 = smov [#allocation2]  }
  0x16   : > { %p1071_p4 = pnand %p728_p1, %p1036_p5  ;;  %s155_s9 = sshll.u32 %s971_s8, 4  ;;  %s156_s9 = int_to_ptr.vmem [resolvable:$true] %s155_s9 }
  0x17   : > { %s165_s27 = sshll.u32 %s1311_s2, 4  ;;  %p712_p2 = pnand %p711_p0, %p79_p3  ;;  %s166_s27 = int_to_ptr.hbm [resolvable:$true] %s165_s27 }
  0x18   : > { %s32_s10 = sadd.s32 1, %s964_s16  ;;  %s178_s11 = sand.u32 1, %s968_s17  }
  0x19   : > { %717 = dma.hbm_to_vmem [thread:$0]  (!%p712_p2), %s166_s27, 64, %s168_s30, [#allocation6]  }
  0x1a   : > { %s153_s7 = sshll.u32 %s1314_s0, 4  ;;  %p34_p6 = scmp.ge.s32.totalorder %s32_s10, 2  ;;  %s154_s7 = int_to_ptr.hbm [resolvable:$true] %s153_s7 }
  0x1b   : > { %714 = dma.hbm_to_vmem [thread:$0]  (!%p712_p2), %s154_s7, 512, %s156_s9, [#allocation3]  }
  0x1c   : > { %s180_s19 = sand.u32 1, %s956_s14   ;;  %s697_s21 = sshll.u32 %s964_s16, 10 }
  0x1d   : > { %s1321_s10 = smov (%p34_p6, %s32_s10), 0  ;;  %s681_s25 = sshll.u32 %s180_s19, 10 }
  0x1e   : > { %s188_s27 = scalar_lea.hbm %s1302_s1, %s697_s21  ;;  %s62_s30 = ssub.s32 %s964_s16, %s1321_s10 }
  0x1f   : > { %p63_p5 = scmp.eq.s32.totalorder %s62_s30, 0  ;;  %s189_s5 = sshll.u32 %s188_s27, 4  ;;  %s190_s5 = int_to_ptr.hbm [resolvable:$true] %s189_s5 }
  0x20   : > { %s182_s6 = scalar_lea.vmem [#allocation5], %s681_s25  ;;  %s179_s9 = scalar_lea.sflag [#allocation6], %s178_s11 }
  0x21   : > { %s191_s7 = sshll.u32 %s182_s6, 4  ;;  %s972_s0 = smov 512   ;;  %s192_s7 = int_to_ptr.vmem [resolvable:$true] %s191_s7 }
  0x22   : > { %s1092_s8 = scalar_select %p63_p5, %s956_s14, %s65_s20  }
  0x23   : > { %s973_s2 = smov 32   ;;  %203 = sbr.rel (%p1059_p12) target bundleno = 321 (0x141), region = 32 }
  0x24   : > { %721 = dma.hbm_to_vmem [thread:$0]  (!%p1071_p4), %s190_s5, 16384, %s192_s7, %s179_s9, %s972_s0, %s972_s0, %s973_s2  }
  0x28   : > { %931 = dma.done.wait (%p79_p3), [#allocation3], 512  }
  0x29   : > { %933 = vsyncadd (%p79_p3), [#allocation3], 4294966784  ;;  %s210_s20 = sand.u32 1, %s1025_s18   ;;  %s1104_s19 = sand.u32 1, %s952_s13  }
  0x2a   : > { %s687_s11 = sshll.u32 %s1104_s19, 10  ;;  %s211_s21 = scalar_lea.sflag [#allocation6], %s210_s20 }
  0x2b   : > { %s1107_s4 = scalar_lea.vmem [#allocation5], %s687_s11 }
  0x2c   : > { %935 = dma.done.wait (%p1042_p7), %s211_s21, 16384  }
  0x2d   : > { %937 = vsyncadd (%p1042_p7), %s211_s21, 4294950912 }
  0x2e   : > { %939 = dma.done.wait (%p79_p3), [#allocation6], 64  }
  0x2f   : > { %941 = vsyncadd (%p79_p3), [#allocation6], 4294967232  ;;  %v311_v0 = vld [vmem:[%s1107_s4 + $0x1f0] sm:$0xff]  ;;  %v309_v1 = vld [vmem:[%s1107_s4 + $0x1e0] sm:$0xff]  ;;  %s690_s0 = sshll.u32 %s960_s15, 8  ;;  %s689_s22 = sshll.u32 %s1104_s19, 4 }
  0x30   : > { %v312_v2 = vld [vmem:[%s1107_s4 + $0x1f8] sm:$0xff]  ;;  %427 = vmatpush.xpose.msra.mxu2 %v311_v0  ;;  %387 = vmatpush.xpose.msra.mxu0 %v309_v1  ;;  %v310_v3 = vld [vmem:[%s1107_s4 + $0x1e8] sm:$0xff]  ;;  %v307_v4 = vld [vmem:[%s1107_s4 + $0x1d0] sm:$0xff]  ;;  %s378_s2 = sshra.s32 %s690_s0, 7  ;;  %s242_s28 = scalar_lea.vmem [#allocation8], %s689_s22 }
  0x31   : > { %447 = vmatpush.xpose.msra.mxu3 %v312_v2  ;;  %407 = vmatpush.xpose.msra.mxu1 %v310_v3  ;;  %v305_v5 = vld [vmem:[%s1107_s4 + $0x1c0] sm:$0xff]  ;;  %v308_v6 = vld [vmem:[%s1107_s4 + $0x1d8] sm:$0xff]  ;;  %v306_v7 = vld [vmem:[%s1107_s4 + $0x1c8] sm:$0xff]  ;;  %s380_s18 = scalar_lea.vmem [#allocation7], %s378_s2  ;;  %s698_s25 = sshll.u32 %s960_s15, 4 }
  0x32   : > { %v303_v8 = vld [vmem:[%s1107_s4 + $0x1b0] sm:$0xff]  ;;  %v301_v9 = vld [vmem:[%s1107_s4 + $0x1a0] sm:$0xff]  ;;  %v304_v10 = vld [vmem:[%s1107_s4 + $0x1b8] sm:$0xff]  ;;  %s565_s27 = scalar_lea.hbm %s1304_s3, %s698_s25  ;;  %s567_s30 = sshll.u32 %s242_s28, 4  ;;  %s568_s30 = int_to_ptr.vmem [resolvable:$true] %s567_s30 }
  0x33   : > { %v302_v11 = vld [vmem:[%s1107_s4 + $0x1a8] sm:$0xff]  ;;  %v299_v12 = vld [vmem:[%s1107_s4 + $0x190] sm:$0xff]  ;;  %v297_v13 = vld [vmem:[%s1107_s4 + $0x180] sm:$0xff]  ;;  %s569_s5 = sshll.u32 %s565_s27, 4  ;;  %s552_s6 = scalar_lea.sflag [#allocation4], %s1104_s19  ;;  %s570_s5 = int_to_ptr.hbm [resolvable:$true] %s569_s5 }
  0x34   : > { %428 = vmatpush.xpose.msra.mxu2 %v307_v4  ;;  %388 = vmatpush.xpose.msra.mxu0 %v305_v5  ;;  %v300_v14 = vld [vmem:[%s1107_s4 + $0x198] sm:$0xff]  ;;  %v298_v15 = vld [vmem:[%s1107_s4 + $0x188] sm:$0xff]  ;;  %v295_v16 = vld [vmem:[%s1107_s4 + $0x170] sm:$0xff]  ;;  %s892_s7 = sshra.s32 %s570_s5, 4  ;;  %s898_s11 = scalar_lea.hbm %s1304_s3, 32  ;;  %s893_s7 = int_to_ptr.hbm [resolvable:$true] %s892_s7 }
  0x35   : > { %448 = vmatpush.xpose.msra.mxu3 %v308_v6  ;;  %408 = vmatpush.xpose.msra.mxu1 %v306_v7  ;;  %v293_v17 = vld [vmem:[%s1107_s4 + $0x160] sm:$0xff]  ;;  %v296_v18 = vld [vmem:[%s1107_s4 + $0x178] sm:$0xff]  ;;  %v294_v19 = vld [vmem:[%s1107_s4 + $0x168] sm:$0xff]  ;;  %s894_s9 = scalar_lea.hbm %s893_s7, 16  ;;  %p899_p11 = scmp.lt.s32.totalorder %s893_s7, %s1304_s3 }
  0x36   : > { %v291_v20 = vld [vmem:[%s1107_s4 + $0x150] sm:$0xff]  ;;  %v289_v21 = vld [vmem:[%s1107_s4 + $0x140] sm:$0xff]  ;;  %v292_v22 = vld [vmem:[%s1107_s4 + $0x158] sm:$0xff]  ;;  %p895_p3 = scmp.ne.s32.totalorder %s893_s7, %s894_s9  ;;  %p900_p12 = scmp.lt.s32.totalorder %s898_s11, %s894_s9 }
  0x37   : > { %v290_v23 = vld [vmem:[%s1107_s4 + $0x148] sm:$0xff]  ;;  %v287_v24 = vld [vmem:[%s1107_s4 + $0x130] sm:$0xff]  ;;  %v285_v25 = vld [vmem:[%s1107_s4 + $0x120] sm:$0xff] }
  0x38   : > { %429 = vmatpush.xpose.msra.mxu2 %v303_v8  ;;  %389 = vmatpush.xpose.msra.mxu0 %v301_v9  ;;  %v288_v26 = vld [vmem:[%s1107_s4 + $0x138] sm:$0xff]  ;;  %v286_v27 = vld [vmem:[%s1107_s4 + $0x128] sm:$0xff]  ;;  %v283_v28 = vld [vmem:[%s1107_s4 + $0x110] sm:$0xff]  ;;  %p896_p7 = pnand %p895_p3, %p1046_p8  ;;  %p901_p0 = por %p900_p12, %p899_p11 }
  0x39   : > { %449 = vmatpush.xpose.msra.mxu3 %v304_v10  ;;  %409 = vmatpush.xpose.msra.mxu1 %v302_v11  ;;  %v281_v29 = vld [vmem:[%s1107_s4 + $0x100] sm:$0xff]  ;;  %v284_v30 = vld [vmem:[%s1107_s4 + $0x118] sm:$0xff]  ;;  %v282_v31 = vld [vmem:[%s1107_s4 + $0x108] sm:$0xff] }
  0x3a   : > { %v279_v32 = vld [vmem:[%s1107_s4 + $0xf0] sm:$0xff]  ;;  %v277_v33 = vld [vmem:[%s1107_s4 + $0xe0] sm:$0xff]  ;;  %v280_v34 = vld [vmem:[%s1107_s4 + $0xf8] sm:$0xff]  ;;  %p897_p10 = pneg %p896_p7 }
  0x3b   : > { %v278_v35 = vld [vmem:[%s1107_s4 + $0xe8] sm:$0xff]  ;;  %v275_v36 = vld [vmem:[%s1107_s4 + $0xd0] sm:$0xff]  ;;  %v273_v37 = vld [vmem:[%s1107_s4 + $0xc0] sm:$0xff] }
  0x3c   : > { %430 = vmatpush.xpose.msra.mxu2 %v299_v12  ;;  %390 = vmatpush.xpose.msra.mxu0 %v297_v13  ;;  %v276_v38 = vld [vmem:[%s1107_s4 + $0xd8] sm:$0xff]  ;;  %v274_v39 = vld [vmem:[%s1107_s4 + $0xc8] sm:$0xff]  ;;  %v271_v40 = vld [vmem:[%s1107_s4 + $0xb0] sm:$0xff]  ;;  %p902_p1 = pnand %p901_p0, %p897_p10 }
  0x3d   : > { %450 = vmatpush.xpose.msra.mxu3 %v300_v14  ;;  %410 = vmatpush.xpose.msra.mxu1 %v298_v15  ;;  %v269_v41 = vld [vmem:[%s1107_s4 + $0xa0] sm:$0xff]  ;;  %v272_v42 = vld [vmem:[%s1107_s4 + $0xb8] sm:$0xff]  ;;  %v270_v43 = vld [vmem:[%s1107_s4 + $0xa8] sm:$0xff] }
  0x3e   : > { %v267_v44 = vld [vmem:[%s1107_s4 + $0x90] sm:$0xff]  ;;  %v265_v45 = vld [vmem:[%s1107_s4 + $0x80] sm:$0xff]  ;;  %v268_v46 = vld [vmem:[%s1107_s4 + $0x98] sm:$0xff] }
  0x3f   : > { %v266_v47 = vld [vmem:[%s1107_s4 + $0x88] sm:$0xff]  ;;  %v263_v48 = vld [vmem:[%s1107_s4 + $0x70] sm:$0xff]  ;;  %v261_v49 = vld [vmem:[%s1107_s4 + $0x60] sm:$0xff] }
  0x40   : > { %431 = vmatpush.xpose.msra.mxu2 %v295_v16  ;;  %391 = vmatpush.xpose.msra.mxu0 %v293_v17  ;;  %v264_v50 = vld [vmem:[%s1107_s4 + $0x78] sm:$0xff]  ;;  %v262_v51 = vld [vmem:[%s1107_s4 + $0x68] sm:$0xff]  ;;  %v259_v52 = vld [vmem:[%s1107_s4 + $0x50] sm:$0xff] }
  0x41   : > { %451 = vmatpush.xpose.msra.mxu3 %v296_v18  ;;  %411 = vmatpush.xpose.msra.mxu1 %v294_v19  ;;  %v257_v53 = vld [vmem:[%s1107_s4 + $0x40] sm:$0xff]  ;;  %v260_v54 = vld [vmem:[%s1107_s4 + $0x58] sm:$0xff]  ;;  %v258_v55 = vld [vmem:[%s1107_s4 + $0x48] sm:$0xff] }
  0x42   : > { %v255_v56 = vld [vmem:[%s1107_s4 + $0x30] sm:$0xff]  ;;  %v253_v57 = vld [vmem:[%s1107_s4 + $0x20] sm:$0xff]  ;;  %v256_v58 = vld [vmem:[%s1107_s4 + $0x38] sm:$0xff] }
  0x43   : > { %v254_v59 = vld [vmem:[%s1107_s4 + $0x28] sm:$0xff]  ;;  %v251_v60 = vld [vmem:[%s1107_s4 + $0x10] sm:$0xff]  ;;  %v249_v61 = vld [vmem:[%s1107_s4] sm:$0xff] }
  0x44   : > { %432 = vmatpush.xpose.msra.mxu2 %v291_v20  ;;  %392 = vmatpush.xpose.msra.mxu0 %v289_v21  ;;  %v375_v62 = vld [vmem:[%s1107_s4 + $0x3f0] sm:$0xff]  ;;  %v252_v63 = vld [vmem:[%s1107_s4 + $0x18] sm:$0xff]  ;;  %v373_v0 = vld [vmem:[%s1107_s4 + $0x3e0] sm:$0xff] }
  0x45   : > { %452 = vmatpush.xpose.msra.mxu3 %v292_v22  ;;  %412 = vmatpush.xpose.msra.mxu1 %v290_v23  ;;  %v376_v1 = vld [vmem:[%s1107_s4 + $0x3f8] sm:$0xff]  ;;  %v250_v2 = vld [vmem:[%s1107_s4 + $0x8] sm:$0xff]  ;;  %v371_v4 = vld [vmem:[%s1107_s4 + $0x3d0] sm:$0xff] }
  0x46   : > { %v374_v3 = vld [vmem:[%s1107_s4 + $0x3e8] sm:$0xff]  ;;  %v369_v5 = vld [vmem:[%s1107_s4 + $0x3c0] sm:$0xff]  ;;  %v372_v6 = vld [vmem:[%s1107_s4 + $0x3d8] sm:$0xff] }
  0x47   : > { %v370_v7 = vld [vmem:[%s1107_s4 + $0x3c8] sm:$0xff]  ;;  %v367_v8 = vld [vmem:[%s1107_s4 + $0x3b0] sm:$0xff]  ;;  %v365_v9 = vld [vmem:[%s1107_s4 + $0x3a0] sm:$0xff] }
  0x48   : > { %433 = vmatpush.xpose.msra.mxu2 %v287_v24  ;;  %393 = vmatpush.xpose.msra.mxu0 %v285_v25  ;;  %v368_v10 = vld [vmem:[%s1107_s4 + $0x3b8] sm:$0xff]  ;;  %v366_v11 = vld [vmem:[%s1107_s4 + $0x3a8] sm:$0xff]  ;;  %v363_v12 = vld [vmem:[%s1107_s4 + $0x390] sm:$0xff] }
  0x49   : > { %453 = vmatpush.xpose.msra.mxu3 %v288_v26  ;;  %413 = vmatpush.xpose.msra.mxu1 %v286_v27  ;;  %v361_v13 = vld [vmem:[%s1107_s4 + $0x380] sm:$0xff]  ;;  %v364_v14 = vld [vmem:[%s1107_s4 + $0x398] sm:$0xff]  ;;  %v362_v15 = vld [vmem:[%s1107_s4 + $0x388] sm:$0xff] }
  0x4a   : > { %v359_v16 = vld [vmem:[%s1107_s4 + $0x370] sm:$0xff]  ;;  %v357_v17 = vld [vmem:[%s1107_s4 + $0x360] sm:$0xff]  ;;  %v360_v18 = vld [vmem:[%s1107_s4 + $0x378] sm:$0xff] }
  0x4b   : > { %v358_v19 = vld [vmem:[%s1107_s4 + $0x368] sm:$0xff]  ;;  %v355_v20 = vld [vmem:[%s1107_s4 + $0x350] sm:$0xff]  ;;  %v353_v21 = vld [vmem:[%s1107_s4 + $0x340] sm:$0xff] }
  0x4c   : > { %434 = vmatpush.xpose.msra.mxu2 %v283_v28  ;;  %394 = vmatpush.xpose.msra.mxu0 %v281_v29  ;;  %v356_v22 = vld [vmem:[%s1107_s4 + $0x358] sm:$0xff]  ;;  %v354_v23 = vld [vmem:[%s1107_s4 + $0x348] sm:$0xff]  ;;  %v351_v24 = vld [vmem:[%s1107_s4 + $0x330] sm:$0xff] }
  0x4d   : > { %454 = vmatpush.xpose.msra.mxu3 %v284_v30  ;;  %414 = vmatpush.xpose.msra.mxu1 %v282_v31  ;;  %v1206_v25 = vld [vmem:[#allocation2 + $0x10] sm:$0xff]  ;;  %v349_v26 = vld [vmem:[%s1107_s4 + $0x320] sm:$0xff]  ;;  %v352_v27 = vld [vmem:[%s1107_s4 + $0x338] sm:$0xff] }
  0x4e   : > { %v350_v28 = vld [vmem:[%s1107_s4 + $0x328] sm:$0xff]  ;;  %v1212_v29 = vld [vmem:[#allocation2] sm:$0xff]  ;;  %v1214_v30 = vld [vmem:[#allocation2 + $0x18] sm:$0xff] }
  0x4f   : > { %v347_v31 = vld [vmem:[%s1107_s4 + $0x310] sm:$0xff] }
  0x50   : > { %435 = vmatpush.xpose.msra.mxu2 %v279_v32  ;;  %395 = vmatpush.xpose.msra.mxu0 %v277_v33  ;;  %v1217_v32 = vld [vmem:[#allocation2 + $0x8] sm:$0xff]  ;;  %v345_v33 = vld [vmem:[%s1107_s4 + $0x300] sm:$0xff] }
  0x51   : > { %455 = vmatpush.xpose.msra.mxu3 %v280_v34  ;;  %415 = vmatpush.xpose.msra.mxu1 %v278_v35  ;;  %v348_v34 = vld [vmem:[%s1107_s4 + $0x318] sm:$0xff]  ;;  %v346_v35 = vld [vmem:[%s1107_s4 + $0x308] sm:$0xff] }
  0x54   : > { %436 = vmatpush.xpose.msra.mxu2 %v275_v36  ;;  %396 = vmatpush.xpose.msra.mxu0 %v273_v37  ;;  %v343_v36 = vld [vmem:[%s1107_s4 + $0x2f0] sm:$0xff]  ;;  %v341_v37 = vld [vmem:[%s1107_s4 + $0x2e0] sm:$0xff] }
  0x55   : > { %456 = vmatpush.xpose.msra.mxu3 %v276_v38  ;;  %416 = vmatpush.xpose.msra.mxu1 %v274_v39  ;;  %v344_v38 = vld [vmem:[%s1107_s4 + $0x2f8] sm:$0xff]  ;;  %v342_v39 = vld [vmem:[%s1107_s4 + $0x2e8] sm:$0xff] }
  0x58   : > { %437 = vmatpush.xpose.msra.mxu2 %v271_v40  ;;  %397 = vmatpush.xpose.msra.mxu0 %v269_v41  ;;  %v339_v40 = vld [vmem:[%s1107_s4 + $0x2d0] sm:$0xff]  ;;  %v337_v41 = vld [vmem:[%s1107_s4 + $0x2c0] sm:$0xff] }
  0x59   : > { %457 = vmatpush.xpose.msra.mxu3 %v272_v42  ;;  %417 = vmatpush.xpose.msra.mxu1 %v270_v43  ;;  %v340_v42 = vld [vmem:[%s1107_s4 + $0x2d8] sm:$0xff]  ;;  %v338_v43 = vld [vmem:[%s1107_s4 + $0x2c8] sm:$0xff] }
  0x5c   : > { %438 = vmatpush.xpose.msra.mxu2 %v267_v44  ;;  %398 = vmatpush.xpose.msra.mxu0 %v265_v45  ;;  %v335_v44 = vld [vmem:[%s1107_s4 + $0x2b0] sm:$0xff]  ;;  %v333_v45 = vld [vmem:[%s1107_s4 + $0x2a0] sm:$0xff] }
  0x5d   : > { %458 = vmatpush.xpose.msra.mxu3 %v268_v46  ;;  %418 = vmatpush.xpose.msra.mxu1 %v266_v47  ;;  %v336_v46 = vld [vmem:[%s1107_s4 + $0x2b8] sm:$0xff]  ;;  %v334_v47 = vld [vmem:[%s1107_s4 + $0x2a8] sm:$0xff] }
  0x60   : > { %439 = vmatpush.xpose.msra.mxu2 %v263_v48  ;;  %399 = vmatpush.xpose.msra.mxu0 %v261_v49  ;;  %v331_v48 = vld [vmem:[%s1107_s4 + $0x290] sm:$0xff]  ;;  %v329_v49 = vld [vmem:[%s1107_s4 + $0x280] sm:$0xff] }
  0x61   : > { %459 = vmatpush.xpose.msra.mxu3 %v264_v50  ;;  %419 = vmatpush.xpose.msra.mxu1 %v262_v51  ;;  %v332_v50 = vld [vmem:[%s1107_s4 + $0x298] sm:$0xff]  ;;  %v330_v51 = vld [vmem:[%s1107_s4 + $0x288] sm:$0xff] }
  0x64   : > { %440 = vmatpush.xpose.msra.mxu2 %v259_v52  ;;  %400 = vmatpush.xpose.msra.mxu0 %v257_v53  ;;  %v327_v52 = vld [vmem:[%s1107_s4 + $0x270] sm:$0xff]  ;;  %v325_v53 = vld [vmem:[%s1107_s4 + $0x260] sm:$0xff] }
  0x65   : > { %460 = vmatpush.xpose.msra.mxu3 %v260_v54  ;;  %420 = vmatpush.xpose.msra.mxu1 %v258_v55  ;;  %v328_v54 = vld [vmem:[%s1107_s4 + $0x278] sm:$0xff]  ;;  %v326_v55 = vld [vmem:[%s1107_s4 + $0x268] sm:$0xff] }
  0x68   : > { %441 = vmatpush.xpose.msra.mxu2 %v255_v56  ;;  %401 = vmatpush.xpose.msra.mxu0 %v253_v57  ;;  %v323_v56 = vld [vmem:[%s1107_s4 + $0x250] sm:$0xff]  ;;  %v321_v57 = vld [vmem:[%s1107_s4 + $0x240] sm:$0xff] }
  0x69   : > { %461 = vmatpush.xpose.msra.mxu3 %v256_v58  ;;  %421 = vmatpush.xpose.msra.mxu1 %v254_v59  ;;  %v324_v58 = vld [vmem:[%s1107_s4 + $0x258] sm:$0xff]  ;;  %v322_v59 = vld [vmem:[%s1107_s4 + $0x248] sm:$0xff] }
  0x6c   : > { %442 = vmatpush.xpose.msra.mxu2 %v251_v60  ;;  %402 = vmatpush.xpose.msra.mxu0 %v249_v61  ;;  %v319_v60 = vld [vmem:[%s1107_s4 + $0x230] sm:$0xff]  ;;  %v317_v61 = vld [vmem:[%s1107_s4 + $0x220] sm:$0xff] }
  0x6d   : > { %462 = vmatpush.xpose.msra.mxu3 %v252_v63  ;;  %422 = vmatpush.xpose.msra.mxu1 %v250_v2  ;;  %v318_v63 = vld [vmem:[%s1107_s4 + $0x228] sm:$0xff]  ;;  %v316_v2 = vld [vmem:[%s1107_s4 + $0x218] sm:$0xff] }
  0x6f   : > { %443 = vmatmul.f32.vlgmr.msra.gmra.mxu2 %v1206_v25  ;;  %403 = vmatmul.f32.vlgmr.msra.gmra.mxu0 %v1212_v29 }
  0x70   : > { %507 = vmatpush.xpose.msrb.mxu2 %v375_v62  ;;  %467 = vmatpush.xpose.msrb.mxu0 %v373_v0  ;;  %v320_v62 = vld [vmem:[%s1107_s4 + $0x238] sm:$0xff]  ;;  %v315_v0 = vld [vmem:[%s1107_s4 + $0x210] sm:$0xff] }
  0x71   : > { %527 = vmatpush.xpose.msrb.mxu3 %v376_v1  ;;  %487 = vmatpush.xpose.msrb.mxu1 %v374_v3  ;;  %v313_v1 = vld [vmem:[%s1107_s4 + $0x200] sm:$0xff]  ;;  %v314_v3 = vld [vmem:[%s1107_s4 + $0x208] sm:$0xff] }
  0x72   : > { %463 = vmatmul.f32.vlgmr.msra.gmra.mxu3 %v1214_v30  ;;  %423 = vmatmul.f32.vlgmr.msra.gmra.mxu1 %v1217_v32 }
  0x74   : > { %508 = vmatpush.xpose.msrb.mxu2 %v371_v4  ;;  %468 = vmatpush.xpose.msrb.mxu0 %v369_v5  ;;  %v381_v4 = vld [vmem:[%s380_s18] sm:$0x3] }
  0x75   : > { %528 = vmatpush.xpose.msrb.mxu3 %v372_v6  ;;  %488 = vmatpush.xpose.msrb.mxu1 %v370_v7  ;;  %v383_v5 = vperm.slane %v381_v4, 0 }
  0x78   : > { %509 = vmatpush.xpose.msrb.mxu2 %v367_v8  ;;  %469 = vmatpush.xpose.msrb.mxu0 %v365_v9 }
  0x79   : > { %529 = vmatpush.xpose.msrb.mxu3 %v368_v10  ;;  %489 = vmatpush.xpose.msrb.mxu1 %v366_v11 }
  0x7c   : > { %510 = vmatpush.xpose.msrb.mxu2 %v363_v12  ;;  %470 = vmatpush.xpose.msrb.mxu0 %v361_v13 }
  0x7d   : > { %530 = vmatpush.xpose.msrb.mxu3 %v364_v14  ;;  %490 = vmatpush.xpose.msrb.mxu1 %v362_v15  ;;  %v384_v15 = vperm.slane %v381_v4, 1 }
  0x80   : > { %511 = vmatpush.xpose.msrb.mxu2 %v359_v16  ;;  %471 = vmatpush.xpose.msrb.mxu0 %v357_v17 }
  0x81   : > { %531 = vmatpush.xpose.msrb.mxu3 %v360_v18  ;;  %491 = vmatpush.xpose.msrb.mxu1 %v358_v19 }
  0x84   : > { %512 = vmatpush.xpose.msrb.mxu2 %v355_v20  ;;  %472 = vmatpush.xpose.msrb.mxu0 %v353_v21 }
  0x85   : > { %532 = vmatpush.xpose.msrb.mxu3 %v356_v22  ;;  %492 = vmatpush.xpose.msrb.mxu1 %v354_v23 }
  0x88   : > { %513 = vmatpush.xpose.msrb.mxu2 %v351_v24  ;;  %473 = vmatpush.xpose.msrb.mxu0 %v349_v26 }
  0x89   : > { %533 = vmatpush.xpose.msrb.mxu3 %v352_v27  ;;  %493 = vmatpush.xpose.msrb.mxu1 %v350_v28 }
  0x8c   : > { %514 = vmatpush.xpose.msrb.mxu2 %v347_v31  ;;  %474 = vmatpush.xpose.msrb.mxu0 %v345_v33 }
  0x8d   : > { %534 = vmatpush.xpose.msrb.mxu3 %v348_v34  ;;  %494 = vmatpush.xpose.msrb.mxu1 %v346_v35 }
  0x90   : > { %515 = vmatpush.xpose.msrb.mxu2 %v343_v36  ;;  %475 = vmatpush.xpose.msrb.mxu0 %v341_v37 }
  0x91   : > { %535 = vmatpush.xpose.msrb.mxu3 %v344_v38  ;;  %495 = vmatpush.xpose.msrb.mxu1 %v342_v39 }
  0x94   : > { %516 = vmatpush.xpose.msrb.mxu2 %v339_v40  ;;  %476 = vmatpush.xpose.msrb.mxu0 %v337_v41 }
  0x95   : > { %536 = vmatpush.xpose.msrb.mxu3 %v340_v42  ;;  %496 = vmatpush.xpose.msrb.mxu1 %v338_v43 }
  0x98   : > { %517 = vmatpush.xpose.msrb.mxu2 %v335_v44  ;;  %477 = vmatpush.xpose.msrb.mxu0 %v333_v45 }
  0x99   : > { %537 = vmatpush.xpose.msrb.mxu3 %v336_v46  ;;  %497 = vmatpush.xpose.msrb.mxu1 %v334_v47 }
  0x9c   : > { %518 = vmatpush.xpose.msrb.mxu2 %v331_v48  ;;  %478 = vmatpush.xpose.msrb.mxu0 %v329_v49 }
  0x9d   : > { %538 = vmatpush.xpose.msrb.mxu3 %v332_v50  ;;  %498 = vmatpush.xpose.msrb.mxu1 %v330_v51 }
  0xa0   : > { %519 = vmatpush.xpose.msrb.mxu2 %v327_v52  ;;  %479 = vmatpush.xpose.msrb.mxu0 %v325_v53 }
  0xa1   : > { %539 = vmatpush.xpose.msrb.mxu3 %v328_v54  ;;  %499 = vmatpush.xpose.msrb.mxu1 %v326_v55 }
  0xa4   : > { %520 = vmatpush.xpose.msrb.mxu2 %v323_v56  ;;  %480 = vmatpush.xpose.msrb.mxu0 %v321_v57 }
  0xa5   : > { %540 = vmatpush.xpose.msrb.mxu3 %v324_v58  ;;  %500 = vmatpush.xpose.msrb.mxu1 %v322_v59 }
  0xa8   : > { %521 = vmatpush.xpose.msrb.mxu2 %v319_v60  ;;  %481 = vmatpush.xpose.msrb.mxu0 %v317_v61 }
  0xa9   : > { %541 = vmatpush.xpose.msrb.mxu3 %v320_v62  ;;  %501 = vmatpush.xpose.msrb.mxu1 %v318_v63 }
  0xac   : > { %522 = vmatpush.xpose.msrb.mxu2 %v315_v0  ;;  %482 = vmatpush.xpose.msrb.mxu0 %v313_v1 }
  0xad   : > { %542 = vmatpush.xpose.msrb.mxu3 %v316_v2  ;;  %502 = vmatpush.xpose.msrb.mxu1 %v314_v3 }
  0xaf   : > { %523 = vmatmul.f32.vlgmr.msrb.gmra.mxu2 %v1206_v25  ;;  %483 = vmatmul.f32.vlgmr.msrb.gmra.mxu0 %v1212_v29 }
  0xb0   : > { %543 = vmatmul.f32.vlgmr.msrb.gmra.mxu3 %v1214_v30  ;;  %503 = vmatmul.f32.vlgmr.msrb.gmra.mxu1 %v1217_v32 }
  0xec   : > { %v404_v6 = vpop.f32.mrf.mxu0 }
  0xed   : > { %v405_v7 = vadd.f32 %v404_v6, %v383_v5 }
  0xef   : > { %v424_v8 = vpop.f32.mrf.mxu1 }
  0xf0   : > { %v425_v10 = vadd.f32 %v424_v8, %v405_v7 }
  0xf2   : > { %v444_v9 = vpop.f32.mrf.mxu2 }
  0xf3   : > { %v445_v11 = vadd.f32 %v444_v9, %v425_v10 }
  0xf5   : > { %v464_v12 = vpop.f32.mrf.mxu3 }
  0xf6   : > { %v465_v13 = vadd.f32 %v464_v12, %v445_v11 }
  0xf8   : > { %784 = vtanh.f32 %v465_v13 }
  0xfe   : > { %v785_v14 = vpop.eup %784 }
  0xff   : > { %549 = vst [vmem:[%s242_s28] sm:$0xff] %v785_v14 }
 0x12c   : > { %v484_v16 = vpop.f32.mrf.mxu0 }
 0x12d   : > { %v485_v17 = vadd.f32 %v484_v16, %v384_v15  ;;  %v504_v18 = vpop.f32.mrf.mxu1 }
 0x12f   : > { %v505_v19 = vadd.f32 %v504_v18, %v485_v17 }
 0x132   : > { %v524_v20 = vpop.f32.mrf.mxu2 }
 0x133   : > { %v525_v21 = vadd.f32 %v524_v20, %v505_v19  ;;  %v544_v22 = vpop.f32.mrf.mxu3 }
 0x135   : > { %v545_v23 = vadd.f32 %v544_v22, %v525_v21 }
 0x137   : > { %786 = vtanh.f32 %v545_v23 }
 0x13d   : > { %v787_v24 = vpop.eup %786 }
 0x13e   : > { %550 = vst [vmem:[%s242_s28 + $0x8] sm:$0xff] %v787_v24 }
 0x13f   : > { %905 = shalt.err (!%p902_p1)
}
 0x140   : > { %709 = dma.vmem_to_hbm [thread:$0]  (%p1046_p8), %s568_s30, 256, %s570_s5, %s552_s6  }
 0x141 PF: > { %s581_s19 = sand.u32 1, %s948_s12   ;;  %p723_p2 = pnand %p680_p13, %p1050_p9 }
 0x142   : > { %s582_s0 = scalar_lea.sflag [#allocation4], %s581_s19 }
 0x143   : > { %p724_p4 = pneg %p723_p2 }
 0x145   : > { %943 = dma.done.wait (%p724_p4), %s582_s0, 256  }
 0x146   : > { %945 = vsyncadd (%p724_p4), %s582_s0, 4294967040  ;;  %s20_s17 = sadd.s32 1, %s968_s17   ;;  %s1315_s12 = smov %s952_s13 }
 0x147   : > { %p17_p6 = scmp.ge.s32.totalorder %s20_s17, 4   ;;  %s1316_s13 = smov %s956_s14 }
 0x148   : > { %s1317_s14 = smov %s1092_s8  ;;  %s1318_s15 = smov %s964_s16 }
 0x149   : > { %s1319_s16 = smov %s1321_s10  ;;  %19 = sbr.rel (!%p17_p6) target bundleno = 10 (0xa), region = 88 }
 0x14e   :  { %588 = vsyncpa [#allocation3], 1 }
 0x14f   :  { %590 = vsyncpa [#allocation3 + $0x1], 1 }
 0x150   :  { %591 = vsyncpa [#allocation6], 1 }
 0x151   :  { %593 = vsyncpa [#allocation6 + $0x1], 1 }
 0x152   :  { %594 = vsyncpa [#allocation4], 1 }
 0x153   :  { %596 = vsyncpa [#allocation4 + $0x1], 1 }

</bundles_post_ra>
